<compile_context>
chip_gen: v6e
topology: v6e:2x2x1
jax: 0.10.0
libtpu: 0.0.40
codegen_flags: <defaults>
</compile_context>

<pallas_src>
import jax
import jax.numpy as jnp
from jax import lax
from jax.experimental import pallas as pl
from jax.experimental.pallas import tpu as pltpu


def _round_up(x, m):
    return (x + m - 1) // m * m


def _round_down(x, m):
    return x // m * m


def _cdiv(a, b):
    return (a + b - 1) // b


_LANE_CHUNK = 512          # lanes per inner compute tile (bounds live f32 accumulator)
_ROW_SUB = 8               # rows per inner compute tile (one f32 sublane tile)
_TARGET_STEP_BYTES = 6 << 20   # aim for ~4-8 MiB of streamed input per grid step


def _tpu_vmem_info():
    """Returns (vmem capacity bytes, usable budget bytes, #tensorcores per chip)."""
    cap = 64 << 20                         # conservative default (v7x per-TC VMEM)
    try:
        cap = int(pltpu.get_tpu_info().vmem_capacity_bytes)
    except Exception:
        pass
    budget = min(cap * 3 // 4, 96 << 20)   # ~48 MiB on v7x, ~96 MiB on v5e/v6e
    n_tc = 1
    try:
        kind = jax.devices()[0].device_kind.lower()
        if ("v7" in kind) or ("7x" in kind):
            n_tc = 2
    except Exception:
        pass
    return cap, budget, n_tc


def _make_kernel(*, num_groups, feat_dim, row_extent, lane_extent, fused):
    """Weighted group reduction over one block.

    fused=True : f_ref is (tb, G*feat_dim)  -> group g lives at lanes [g*feat_dim, ...)
    fused=False: f_ref is (tb, G, lane_ext) -> group g is f_ref[:, g, :]
    o_ref      : (tb, lane_extent)
    """
    G = num_groups

    def kernel(w_ref, f_ref, o_ref):
        def load_group(r0, rb, g, c0, cw):
            if fused:
                return f_ref[pl.ds(r0, rb), pl.ds(g * feat_dim + c0, cw)]
            return f_ref[pl.ds(r0, rb), g, pl.ds(c0, cw)]

        def tile(r0, rb, c0, cw, w_rows):
            acc = w_rows[:, 0:1] * load_group(r0, rb, 0, c0, cw).astype(jnp.float32)
            for g in range(1, G):
                acc = acc + w_rows[:, g:g + 1] * load_group(r0, rb, g, c0, cw).astype(jnp.float32)
            o_ref[pl.ds(r0, rb), pl.ds(c0, cw)] = acc.astype(o_ref.dtype)

        def row_block(r0, rb):
            w_rows = w_ref[pl.ds(r0, rb), :]            # (rb, G) f32
            n_lane = lane_extent // _LANE_CHUNK
            if n_lane > 0:
                def lane_body(j, carry):
                    c0 = pl.multiple_of(j * _LANE_CHUNK, _LANE_CHUNK)
                    tile(r0, rb, c0, _LANE_CHUNK, w_rows)
                    return carry
                lax.fori_loop(0, n_lane, lane_body, 0)
            lane_tail = lane_extent - n_lane * _LANE_CHUNK
            if lane_tail > 0:
                tile(r0, rb, n_lane * _LANE_CHUNK, lane_tail, w_rows)

        if row_extent <= _ROW_SUB:
            row_block(0, row_extent)
        else:
            n_row = row_extent // _ROW_SUB

            def row_body(i, carry):
                r0 = pl.multiple_of(i * _ROW_SUB, _ROW_SUB)
                row_block(r0, _ROW_SUB)
                return carry

            lax.fori_loop(0, n_row, row_body, 0)
            row_tail = row_extent - n_row * _ROW_SUB
            if row_tail > 0:
                row_block(n_row * _ROW_SUB, row_tail)

    return kernel


def integrate_feats_module(feats, pids, backbone_cls_score, num_same_id=4):
    bs, c, h, w = feats.shape
    assert bs % num_same_id == 0
    G = num_same_id
    chunk = bs // G
    feat_dim = c * h * w
    dsize = jnp.dtype(feats.dtype).itemsize
    sub_t = max(8, 32 // dsize)            # sublane tile: 8 (f32), 16 (bf16), 32 (int8)

    # ---- wrapper glue (tiny, data-dependent): gather + scale + softmax ----
    gathered = backbone_cls_score[jnp.arange(bs), pids].astype(jnp.float32)   # (bs,)
    weights_norm = jax.nn.softmax(gathered.reshape(chunk, G) * 5.0, axis=1)   # (chunk, G) f32

    cap, budget, n_tc = _tpu_vmem_info()
    lane_pad = _round_up(feat_dim, 128)
    min_tb = chunk if chunk <= 8 else 8

    # --- VMEM footprint models (double-buffered in/out blocks + weights block) ---
    def fused_vmem(tb):
        rp = _round_up(tb, sub_t)
        return (2 * rp * _round_up(G * feat_dim, 128) * dsize
                + 2 * rp * lane_pad * dsize
                + 2 * _round_up(tb, 8) * 128 * 4)

    def grouped_vmem(tb, ft):
        ftp = _round_up(ft, 128)
        return (2 * tb * _round_up(G, sub_t) * ftp * dsize
                + 2 * _round_up(tb, sub_t) * ftp * dsize
                + 2 * _round_up(tb, 8) * 128 * 4)

    fused_ok = (feat_dim % 128 == 0) and (fused_vmem(min_tb) <= budget)

    if fused_ok:
        # ---------- fast path: fused lane-dense 2-D layout, grid over row blocks ----------
        row_in_bytes = G * feat_dim * dsize
        if chunk <= 8:
            tb = chunk
        else:
            per_row = max(1, fused_vmem(sub_t) // sub_t)
            tb_vmem = max(8, _round_down(budget // per_row, 8))
            tb_tgt = max(8, _round_down(_TARGET_STEP_BYTES // max(row_in_bytes, 1), 8))
            tb = min(tb_tgt, tb_vmem, max(8, _round_down(chunk, 8)))
            if n_tc >= 2 and chunk >= 16:          # megacore: keep >= 2 grid steps (v7x only)
                tb = min(tb, max(8, _round_up(_cdiv(chunk, 2), 8)))

        operands = (weights_norm, feats.reshape(chunk, G * feat_dim))
        grid = (_cdiv(chunk, tb),)
        in_specs = [pl.BlockSpec((tb, G), lambda i: (i, 0)),
                    pl.BlockSpec((tb, G * feat_dim), lambda i: (i, 0))]
        out_spec = pl.BlockSpec((tb, feat_dim), lambda i: (i, 0))
        dim_sem = ("parallel",)
        kernel = _make_kernel(num_groups=G, feat_dim=feat_dim,
                              row_extent=tb, lane_extent=feat_dim, fused=True)
        vmem_need = fused_vmem(tb)
    else:
        # ---------- general path: 3-D (chunk, G, feat_dim) layout, optional F-tiling ----------
        if grouped_vmem(min_tb, feat_dim) <= budget:
            ft = feat_dim
            if chunk <= 8:
                tb = chunk
            else:
                row_in_bytes = G * feat_dim * dsize
                per_row = max(1, grouped_vmem(sub_t, feat_dim) // sub_t)
                tb_vmem = max(8, _round_down(budget // per_row, 8))
                tb_tgt = max(8, _round_down(_TARGET_STEP_BYTES // max(row_in_bytes, 1), 8))
                tb = min(tb_tgt, tb_vmem, max(8, _round_down(chunk, 8)))
                if n_tc >= 2 and chunk >= 16:
                    tb = min(tb, max(8, _round_up(_cdiv(chunk, 2), 8)))
        else:
            # feature dim too large for a whole-row block: tile the lane axis.
            tb = min_tb
            per_lane = max(1, 2 * tb * _round_up(G, sub_t) * dsize
                           + 2 * _round_up(tb, sub_t) * dsize)
            wbytes = 2 * _round_up(tb, 8) * 128 * 4
            ft_vmem = max(128, _round_down(max(budget - wbytes, 128 * per_lane) // per_lane, 128))
            ft_tgt = max(128, _round_down(_TARGET_STEP_BYTES // max(tb * G * dsize, 1), 128))
            ft = min(ft_vmem, ft_tgt, _round_up(feat_dim, 128))

        operands = (weights_norm, feats.reshape(chunk, G, feat_dim))
        grid = (_cdiv(chunk, tb), _cdiv(feat_dim, ft))
        in_specs = [pl.BlockSpec((tb, G), lambda i, f: (i, 0)),
                    pl.BlockSpec((tb, G, ft), lambda i, f: (i, 0, f))]
        out_spec = pl.BlockSpec((tb, ft), lambda i, f: (i, f))
        dim_sem = ("parallel", "parallel")
        kernel = _make_kernel(num_groups=G, feat_dim=feat_dim,
                              row_extent=tb, lane_extent=ft, fused=False)
        vmem_need = grouped_vmem(tb, ft)

    # Always set the scoped-VMEM limit (v5e default is only 16 MiB) with headroom for
    # compiler-internal scratch, but never crowd the physical capacity.
    vmem_limit = int(max(vmem_need + (4 << 20), 16 << 20))
    vmem_limit = int(min(vmem_limit, max(cap - (8 << 20), vmem_need + (1 << 20))))

    out2d = pl.pallas_call(
        kernel,
        out_shape=jax.ShapeDtypeStruct((chunk, feat_dim), feats.dtype),
        grid=grid,
        in_specs=in_specs,
        out_specs=out_spec,
        compiler_params=pltpu.CompilerParams(
            dimension_semantics=dim_sem,
            vmem_limit_bytes=vmem_limit),
        cost_estimate=pl.CostEstimate(
            flops=2 * chunk * G * feat_dim,
            transcendentals=0,
            bytes_accessed=(chunk * G * feat_dim * dsize
                            + chunk * feat_dim * dsize
                            + chunk * G * 4)),
    )(*operands)

    integrate_feats = out2d.reshape(chunk, c, h, w)
    integrate_pids = pids[::num_same_id]
    return integrate_feats, integrate_pids


def _reference(feats, pids, backbone_cls_score, num_same_id=4):
    bs, c, h, w = feats.shape
    chunk = bs // num_same_id
    ids_feats = feats.reshape(chunk, num_same_id, c, h, w)
    weights = backbone_cls_score[jnp.arange(bs), pids].reshape(chunk, num_same_id) * 5.0
    wn = jax.nn.softmax(weights, axis=1)
    integrate = jnp.einsum('bx,bxchw->bchw', wn, ids_feats)
    return integrate, pids[::num_same_id]


if __name__ == "__main__":
    key = jax.random.PRNGKey(0)

    # config 1: feat_dim = 1024 (128-aligned  -> fused lane-dense fast path)
    # config 2: feat_dim = 147  (unaligned    -> 3-D grouped path, no padding anywhere)
    configs = [(8, 4, 16, 16, 10), (8, 3, 7, 7, 10)]
    for bs, c, h, w, num_classes in configs:
        k1, k2, k3, key = jax.random.split(key, 4)
        feats = jax.random.normal(k1, (bs, c, h, w), dtype=jnp.float32)
        backbone_cls_score = jax.random.normal(k2, (bs, num_classes), dtype=jnp.float32)
        pids = jax.random.randint(k3, (bs,), 0, num_classes, dtype=jnp.int32)

        out_feats, out_pids = integrate_feats_module(feats, pids, backbone_cls_score)
        jax.block_until_ready(out_feats)
        jax.block_until_ready(out_pids)

        ref_feats, ref_pids = _reference(feats, pids, backbone_cls_score)
        assert out_feats.shape == (bs // 4, c, h, w)
        assert jnp.allclose(out_feats, ref_feats, atol=1e-5, rtol=1e-5)
        assert jnp.array_equal(out_pids, ref_pids)

    print("KERNEL_OK")
</pallas_src>

<mosaic_0001>
module attributes {stable_mosaic.version = 11 : i64} {
  func.func @kernel(%arg0: i32, %arg1: memref<2x4xf32, #tpu.memory_space<vmem>>, %arg2: memref<2x4096xf32, #tpu.memory_space<vmem>>, %arg3: memref<2x1024xf32, #tpu.memory_space<vmem>>) attributes {dimension_semantics = [#tpu.dimension_semantics<parallel>], iteration_bounds = array<i64: 1>, scalar_prefetch = 0 : i64, scratch_operands = 0 : i64, tpu.core_type = #tpu.core_type<tc>, window_params = [{transform_indices = @transform_0, window_bounds = array<i64: 2, 4>}, {transform_indices = @transform_1, window_bounds = array<i64: 2, 4096>}, {transform_indices = @transform_2, window_bounds = array<i64: 2, 1024>}]} {
    %c0 = arith.constant 0 : index
    %c0_0 = arith.constant 0 : index
    %0 = vector.load %arg1[%c0, %c0_0] : memref<2x4xf32, #tpu.memory_space<vmem>>, vector<2x4xf32>
    %c0_i32 = arith.constant 0 : i32
    %c2_i32 = arith.constant 2 : i32
    %1 = arith.addi %c0_i32, %c2_i32 : i32
    %c1_i32 = arith.constant 1 : i32
    scf.for %arg4 = %c0_i32 to %1 step %c1_i32  : i32 {
      %c512_i32 = arith.constant 512 : i32
      %2 = arith.muli %arg4, %c512_i32 : i32
      %3 = tpu.assume_multiple %2, 512 : i32
      %4 = vector.extract_strided_slice %0 {offsets = [0, 0], sizes = [2, 1], strides = [1, 1]} : vector<2x4xf32> to vector<2x1xf32>
      %c0_i32_2 = arith.constant 0 : i32
      %5 = arith.addi %c0_i32_2, %3 : i32
      %c0_3 = arith.constant 0 : index
      %6 = arith.index_cast %5 : i32 to index
      %7 = vector.load %arg2[%c0_3, %6] : memref<2x4096xf32, #tpu.memory_space<vmem>>, vector<2x512xf32>
      %8 = vector.broadcast %4 : vector<2x1xf32> to vector<2x512xf32>
      %9 = arith.mulf %8, %7 : vector<2x512xf32>
      %10 = vector.extract_strided_slice %0 {offsets = [0, 1], sizes = [2, 1], strides = [1, 1]} : vector<2x4xf32> to vector<2x1xf32>
      %c1024_i32 = arith.constant 1024 : i32
      %11 = arith.addi %c1024_i32, %3 : i32
      %c0_4 = arith.constant 0 : index
      %12 = arith.index_cast %11 : i32 to index
      %13 = vector.load %arg2[%c0_4, %12] : memref<2x4096xf32, #tpu.memory_space<vmem>>, vector<2x512xf32>
      %14 = vector.broadcast %10 : vector<2x1xf32> to vector<2x512xf32>
      %15 = arith.mulf %14, %13 : vector<2x512xf32>
      %16 = arith.addf %9, %15 : vector<2x512xf32>
      %17 = vector.extract_strided_slice %0 {offsets = [0, 2], sizes = [2, 1], strides = [1, 1]} : vector<2x4xf32> to vector<2x1xf32>
      %c2048_i32 = arith.constant 2048 : i32
      %18 = arith.addi %c2048_i32, %3 : i32
      %c0_5 = arith.constant 0 : index
      %19 = arith.index_cast %18 : i32 to index
      %20 = vector.load %arg2[%c0_5, %19] : memref<2x4096xf32, #tpu.memory_space<vmem>>, vector<2x512xf32>
      %21 = vector.broadcast %17 : vector<2x1xf32> to vector<2x512xf32>
      %22 = arith.mulf %21, %20 : vector<2x512xf32>
      %23 = arith.addf %16, %22 : vector<2x512xf32>
      %24 = vector.extract_strided_slice %0 {offsets = [0, 3], sizes = [2, 1], strides = [1, 1]} : vector<2x4xf32> to vector<2x1xf32>
      %c3072_i32 = arith.constant 3072 : i32
      %25 = arith.addi %c3072_i32, %3 : i32
      %c0_6 = arith.constant 0 : index
      %26 = arith.index_cast %25 : i32 to index
      %27 = vector.load %arg2[%c0_6, %26] : memref<2x4096xf32, #tpu.memory_space<vmem>>, vector<2x512xf32>
      %28 = vector.broadcast %24 : vector<2x1xf32> to vector<2x512xf32>
      %29 = arith.mulf %28, %27 : vector<2x512xf32>
      %30 = arith.addf %23, %29 : vector<2x512xf32>
      %c0_7 = arith.constant 0 : index
      %31 = arith.index_cast %3 : i32 to index
      %32 = vector.load %arg3[%c0_7, %31] : memref<2x1024xf32, #tpu.memory_space<vmem>>, vector<2x512xf32>
      tpu.vector_store %arg3[%c0_7, %31], %30 {strides = array<i32>} : memref<2x1024xf32, #tpu.memory_space<vmem>>, vector<2x512xf32>,
    }
    %c2_i32_1 = arith.constant 2 : i32
    return
  }
  func.func @transform_0(%arg0: i32) -> (i32, i32) {
    %c0_i32 = arith.constant 0 : i32
    %c0_i32_0 = arith.constant 0 : i32
    return %arg0, %c0_i32 : i32, i32
  }
  func.func @transform_1(%arg0: i32) -> (i32, i32) {
    %c0_i32 = arith.constant 0 : i32
    %c0_i32_0 = arith.constant 0 : i32
    return %arg0, %c0_i32 : i32, i32
  }
  func.func @transform_2(%arg0: i32) -> (i32, i32) {
    %c0_i32 = arith.constant 0 : i32
    %c0_i32_0 = arith.constant 0 : i32
    return %arg0, %c0_i32 : i32, i32
  }
}

</mosaic_0001>

<bundles_post_ra>
// kernel: tpu_custom_call.1
= control target key start
LH: loop header
LB: loop body
LE: loop exit
PB: predicated region body
PF: predicated region fallthrough
CT: control target
= control target key end

     0   :  { %7 = vsyncpa [#allocation3], 0  ;;  %s412_s0 = inlined_call_operand.hbm [shape: f32[2,4], index: 0, kind: input, shape index: {}]   ;;  %s413_s1 = inlined_call_operand.hbm [shape: f32[2,4096], index: 1, kind: input, shape index: {}]   ;;  %s414_s2 = inlined_call_operand.hbm [shape: f32[2,1024], index: 2, kind: output, shape index: {}]  }
   0x1   :  { %8 = vsyncpa [#allocation6], 0 }
   0x2   :  { %9 = vsyncpa [#allocation4], 0  ;;  %s361_s9 = smov [#allocation2]   ;;  %s362_s11 = smov [#allocation5]  }
   0x3   :  { %s16_s10 = sshll.u32 %s361_s9, 4  ;;  %s26_s12 = sshll.u32 %s362_s11, 4  ;;  %s17_s10 = int_to_ptr.vmem [resolvable:$true] %s16_s10  ;;  %s27_s12 = int_to_ptr.vmem [resolvable:$true] %s26_s12 }
   0x4   :  { %s295_s13 = scalar_lea.vmem %s17_s10, 32  ;;  %p300_p1 = scmp.lt.s32.totalorder %s17_s10, %s17_s10 }
   0x5   :  { %p296_p0 = scmp.ne.s32.totalorder %s17_s10, %s295_s13  ;;  %p301_p2 = scmp.lt.s32.totalorder %s295_s13, %s295_s13 }
   0x7   :  { %p302_p3 = por %p301_p2, %p300_p1 }
   0x9   :  { %p303_p4 = pnand %p302_p3, %p296_p0 }
   0xb   :  { %306 = shalt.err (!%p303_p4)
}
   0xc   :  { %19 = dma.hbm_to_vmem [thread:$0]  %s412_s0, 32, %s17_s10, [#allocation3]  }
   0xd   :  { %s315_s16 = scalar_lea.vmem %s27_s12, 1024  ;;  %p320_p6 = scmp.lt.s32.totalorder %s27_s12, %s27_s12 }
   0xe   :  { %p316_p5 = scmp.ne.s32.totalorder %s27_s12, %s315_s16  ;;  %p321_p7 = scmp.lt.s32.totalorder %s315_s16, %s315_s16 }
  0x10   :  { %p322_p8 = por %p321_p7, %p320_p6 }
  0x12   :  { %p323_p9 = pnand %p322_p8, %p316_p5 }
  0x14   :  { %326 = shalt.err (!%p323_p9)
}
  0x15   :  { %29 = dma.hbm_to_vmem [thread:$0]  %s413_s1, 1024, %s27_s12, [#allocation6]  }
  0x16   :  { %351 = dma.done.wait [#allocation3], 32  }
  0x17   :  { %352 = vsyncadd [#allocation3], 4294967264 }
  0x18   :  { %353 = dma.done.wait [#allocation6], 1024  }
  0x19   :  { %354 = vsyncadd [#allocation6], 4294966272  ;;  %v390_v0 = vld [vmem:[#allocation2] sm:$0x3]  ;;  %s392_s19 = smov 0  }
  0x1a LB: > { %v363_v1 = vmov 0   ;;  %v364_v2 = vmov 2   ;;  %v365_v3 = vmov 1   ;;  %v366_v4 = vmov 3   ;;  %s256_s0 = sshll.u32 %s359_s19, 9  ;;  %s42_s19 = sadd.s32 1, %s359_s19   ;;  %s359_s19 = sphi %s392_s19, %s42_s19  }
  0x1b   : > { %278 = vset.pattern.permute.xlu0 %v363_v1  ;;  %280 = vset.pattern.permute.xlu1 %v364_v2  ;;  %s120_s1 = sadd.s32 2048, %s256_s0  ;;  %s80_s20 = sadd.s32 1024, %s256_s0  ;;  %v367_v5 = vmov 1983009808   ;;  %v59_v7 = vlaneseq }
  0x1c   : > { %51 = vperm.xlu0 %278, %v390_v0   ;;  %127 = vperm.xlu1 %280, %v390_v0   ;;  %s44_s21 = sshra.s32 %s256_s0, 7  ;;  %s160_s22 = sadd.s32 3072, %s256_s0  ;;  %v57_v6 = vunpack.c.l.s4 %v367_v5 }
  0x1d   : > { %s121_s23 = sshra.s32 %s120_s1, 7  ;;  %s81_s24 = sshra.s32 %s80_s20, 7  ;;  %v60_v9 = vshrl.u32 %v59_v7, 7 }
  0x1e   : > { %s402_s25 = sshll.u32 %s44_s21, 1  ;;  %s161_s26 = sshra.s32 %s160_s22, 7  ;;  %v58_v8 = vunpack.c.0.s8 %v57_v6 }
  0x1f   : > { %s259_s27 = sshll.u32 %s121_s23, 1  ;;  %s258_s28 = sshll.u32 %s81_s24, 1 }
  0x20   : > { %279 = vset.pattern.permute.xlu0 %v365_v3  ;;  %281 = vset.pattern.permute.xlu1 %v366_v4  ;;  %s260_s29 = sshll.u32 %s161_s26, 1  ;;  %s47_s30 = scalar_lea.vmem [#allocation5], %s402_s25  ;;  %v61_v13 = vsub.s32 %v58_v8, %v60_v9 }
  0x21   : > { %87 = vperm.xlu0 %279, %v390_v0   ;;  %167 = vperm.xlu1 %281, %v390_v0   ;;  %v48_v10 = vld [vmem:[%s47_s30] sm:$0xff]  ;;  %s124_s3 = scalar_lea.vmem [#allocation5], %s259_s27  ;;  %s84_s4 = scalar_lea.vmem [#allocation5], %s258_s28 }
  0x22   : > { %v125_v11 = vld [vmem:[%s124_s3] sm:$0xff]  ;;  %v55_v14 = vcombine.high %v48_v10, %v48_v10  ;;  %s164_s5 = scalar_lea.vmem [#allocation5], %s260_s29  ;;  %v62_v19 = vrot.slane %v48_v10, %v61_v13  ;;  %s223_s6 = scalar_lea.vmem [#allocation7], %s402_s25 }
  0x23   : > { %v85_v12 = vld [vmem:[%s84_s4] sm:$0xff]  ;;  %v131_v16 = vcombine.high %v125_v11, %v125_v11  ;;  %v138_v21 = vrot.slane %v125_v11, %v61_v13  ;;  %p39_p10 = scmp.ge.s32.totalorder %s42_s19, 2  }
  0x24   : > { %v165_v15 = vld [vmem:[%s164_s5] sm:$0xff]  ;;  %v91_v17 = vcombine.high %v85_v12, %v85_v12  ;;  %v69_v20 = vrot.slane %v55_v14, %v61_v13  ;;  %v98_v23 = vrot.slane %v85_v12, %v61_v13  ;;  %v70_v28 = vcombine.high %v62_v19, %v62_v19  ;;  %s368_s7 = smov (%p39_p10), [#allocation7]  }
  0x25   : > { %282 = vset.pattern.permute.xlu0 %v366_v4  ;;  %v171_v18 = vcombine.high %v165_v15, %v165_v15  ;;  %v145_v22 = vrot.slane %v131_v16, %v61_v13  ;;  %v178_v25 = vrot.slane %v165_v15, %v61_v13  ;;  %v146_v31 = vcombine.high %v138_v21, %v138_v21  ;;  %s231_s8 = sshll.u32 (%p39_p10), %s368_s7, 4  ;;  %s232_s8 = int_to_ptr.vmem [resolvable:$true] %s231_s8 }
  0x26   : > { %v105_v24 = vrot.slane %v91_v17, %v61_v13  ;;  %v71_v29 = vcombine.high %v69_v20, %v69_v20  ;;  %v106_v33 = vcombine.high %v98_v23, %v98_v23  ;;  %s327_s9 = scalar_lea.vmem (%p39_p10), %s232_s8, 256  ;;  %p332_p12 = scmp.lt.s32.totalorder (%p39_p10), %s232_s8, %s232_s8 }
  0x27   : > { %v185_v26 = vrot.slane %v171_v18, %v61_v13  ;;  %v147_v32 = vcombine.high %v145_v22, %v145_v22  ;;  %v186_v35 = vcombine.high %v178_v25, %v178_v25  ;;  %p328_p11 = scmp.ne.s32.totalorder (%p39_p10), %s232_s8, %s327_s9  ;;  %p333_p13 = scmp.lt.s32.totalorder (%p39_p10), %s327_s9, %s327_s9 }
  0x28   : > { %v107_v34 = vcombine.high %v105_v24, %v105_v24 }
  0x29   : > { %v187_v36 = vcombine.high %v185_v26, %v185_v26  ;;  %p334_p0 = por (%p39_p10), %p333_p13, %p332_p12 }
  0x2b   :  { %p335_p1 = pnand (%p39_p10), %p334_p0, %p328_p11 }
  0x97   : > { %v52_v27 = vpop.permute.xlu0 %51  ;;  %v128_v30 = vpop.permute.xlu1 %127 }
  0x98   : > { %v76_v37 = vmul.f32 %v62_v19, %v52_v27  ;;  %v77_v38 = vmul.f32 %v70_v28, %v52_v27  ;;  %v78_v39 = vmul.f32 %v69_v20, %v52_v27  ;;  %v79_v40 = vmul.f32 %v71_v29, %v52_v27 }
  0x99   : > { %v152_v41 = vmul.f32 %v138_v21, %v128_v30  ;;  %v153_v42 = vmul.f32 %v146_v31, %v128_v30  ;;  %v154_v43 = vmul.f32 %v145_v22, %v128_v30  ;;  %v155_v44 = vmul.f32 %v147_v32, %v128_v30 }
  0x9c   : > { %v88_v45 = vpop.permute.xlu0 %87  ;;  %v168_v46 = vpop.permute.xlu1 %167 }
  0x9d   : > { %v112_v47 = vmul.f32 %v98_v23, %v88_v45  ;;  %v113_v48 = vmul.f32 %v106_v33, %v88_v45  ;;  %v114_v49 = vmul.f32 %v105_v24, %v88_v45  ;;  %v115_v50 = vmul.f32 %v107_v34, %v88_v45 }
  0x9e   : > { %v192_v51 = vmul.f32 %v178_v25, %v168_v46  ;;  %v193_v52 = vmul.f32 %v186_v35, %v168_v46  ;;  %v194_v53 = vmul.f32 %v185_v26, %v168_v46  ;;  %v195_v54 = vmul.f32 %v187_v36, %v168_v46 }
  0x9f   : > { %v116_v55 = vadd.f32 %v112_v47, %v76_v37  ;;  %v117_v56 = vadd.f32 %v113_v48, %v77_v38  ;;  %v118_v57 = vadd.f32 %v114_v49, %v78_v39  ;;  %v119_v58 = vadd.f32 %v115_v50, %v79_v40 }
  0xa1   : > { %v156_v59 = vadd.f32 %v152_v41, %v116_v55  ;;  %v157_v60 = vadd.f32 %v153_v42, %v117_v56  ;;  %v158_v61 = vadd.f32 %v154_v43, %v118_v57  ;;  %v159_v62 = vadd.f32 %v155_v44, %v119_v58 }
  0xa3   : > { %v196_v63 = vadd.f32 %v192_v51, %v156_v59  ;;  %v197_v1 = vadd.f32 %v193_v52, %v157_v60  ;;  %v198_v2 = vadd.f32 %v194_v53, %v158_v61  ;;  %v199_v3 = vadd.f32 %v195_v54, %v159_v62 }
  0xa5   : > { %v204_v4 = vcombine.low %v196_v63, %v197_v1  ;;  %v205_v5 = vcombine.low %v198_v2, %v199_v3 }
  0xa7   : > { %v212_v6 = vrot.slane %v204_v4, %v61_v13  ;;  %v219_v7 = vrot.slane %v205_v5, %v61_v13  ;;  %41 = sbr.rel (!%p39_p10) target bundleno = 26 (0x1a), region = 48 }
  0xa9   : > { %v220_v8 = vcombine.low %v212_v6, %v219_v7 }
  0xab   : > { %224 = vst [vmem:[%s223_s6] sm:$0xff] %v220_v8 }
  0xac   :  { %338 = shalt.err (!%p335_p1)
}
  0xad   :  { %234 = dma.vmem_to_hbm [thread:$0]  %s232_s8, 256, %s414_s2, [#allocation4]  }
  0xae   :  { %355 = dma.done.wait [#allocation4], 256  }
  0xaf   :  { %356 = vsyncadd [#allocation4], 4294967040 }
  0xb0   :  { %238 = vsyncpa [#allocation3], 1 }
  0xb1   :  { %239 = vsyncpa [#allocation6], 1 }
  0xb2   :  { %240 = vsyncpa [#allocation4], 1 }

</bundles_post_ra>
